<compile_context>
chip_gen: v7x
topology: tpu7x:2x2x1
jax: 0.10.0
libtpu: 0.0.40
codegen_flags: <defaults>
</compile_context>

<pallas_src>
import functools

import jax
import jax.numpy as jnp
from jax.experimental import pallas as pl
from jax.experimental.pallas import tpu as pltpu

IMG_DIM = 1 * 28 * 28   # 784
HIDDEN = 128


def _round_up(n: int, m: int) -> int:
    return -(-n // m) * m


def disc_kernel(x_ref, w1_ref, b1_ref, w2_ref, b2_ref, o_ref):
    # x_ref : (TILE_B, IMG_DIM) f32   streamed activations (cast to bf16 here)
    # w1_ref: (IMG_DIM, HIDDEN) bf16  resident layer-1 weight (pre-transposed)
    # b1_ref: (1, HIDDEN)       f32   resident layer-1 bias
    # w2_ref: (1, HIDDEN)       f32   resident layer-2 weight (row vector)
    # b2_ref: (1, 1)            f32   scalar layer-2 bias in SMEM
    # o_ref : (1, TILE_B)       f32   lane-dense sigmoid output

    # Linear(784 -> 128) on the MXU: in-kernel f32->bf16 cast (VPU, hidden under
    # the x DMA) + bf16 matmul with f32 accumulation.
    x = x_ref[...].astype(jnp.bfloat16)
    h = jnp.dot(x, w1_ref[...], preferred_element_type=jnp.float32)
    h = h + b1_ref[...]

    # LeakyReLU(negative_slope=0.1) in f32 on the VPU.
    h = jnp.where(h > 0, h, 0.1 * h)

    # Linear(128 -> 1): multiply by w2 (VPU), transpose (XLU) so the hidden axis
    # becomes the sublane axis, then reduce -> (1, TILE_B) lane-dense result.
    ht = jnp.transpose(h * w2_ref[...])                     # (HIDDEN, TILE_B)
    z = jnp.sum(ht, axis=0, keepdims=True) + b2_ref[0, 0]

    # Sigmoid: exp + approximate reciprocal both run on the EUP
    # (approx recip error ~1e-3; fine for a GAN discriminator output).
    o_ref[...] = pl.reciprocal(1.0 + jnp.exp(-z), approx=True)


@functools.partial(jax.jit, static_argnames=("tile_b",))
def discriminator_forward(x, w1, b1, w2, b2, *, tile_b=2048):
    """y = sigmoid(leaky_relu(x @ w1 + b1, 0.1) @ w2 + b2); x: (B, 784) f32.

    w1 is the transposed PyTorch weight, shape (784, 128); w2 has shape (128, 1).
    """
    B, d = x.shape
    assert d == IMG_DIM

    if B < 128:
        # Tiny batches: pad to one full 128-row tile (negligible <0.4 MB copy)
        # so the lane-dense output tile stays a multiple of 128.
        rows = 128
        x = jnp.pad(x, ((0, rows - B), (0, 0)))
        tile_b = 128
    else:
        rows = B
        tile_b = _round_up(max(tile_b, 128), 128)
        # Cap at ~ceil(B/2) so there are >= 2 grid steps whenever possible:
        # with dimension_semantics=("parallel",) both v7x TensorCores get work.
        tile_b = min(tile_b, _round_up(-(-B // 2), 128))
    num_tiles = pl.cdiv(rows, tile_b)

    # Weight/bias prep: tiny arrays, cast cost negligible (x itself stays f32).
    w1_bf16 = w1.astype(jnp.bfloat16)
    b1_row = b1.reshape(1, HIDDEN).astype(jnp.float32)
    w2_row = w2.reshape(1, HIDDEN).astype(jnp.float32)
    b2_s = b2.reshape(1, 1).astype(jnp.float32)

    out = pl.pallas_call(
        disc_kernel,
        out_shape=jax.ShapeDtypeStruct((num_tiles, 1, tile_b), jnp.float32),
        grid=(num_tiles,),
        in_specs=[
            pl.BlockSpec((tile_b, IMG_DIM), lambda i: (i, 0)),   # x: streamed f32
            pl.BlockSpec((IMG_DIM, HIDDEN), lambda i: (0, 0)),   # w1: resident
            pl.BlockSpec((1, HIDDEN), lambda i: (0, 0)),         # b1: resident
            pl.BlockSpec((1, HIDDEN), lambda i: (0, 0)),         # w2: resident
            pl.BlockSpec(memory_space=pltpu.MemorySpace.SMEM),   # b2: SMEM scalar
        ],
        # Lane-dense output block: last two dims (1, tile_b) equal the full
        # array dims; the leading per-tile dim is squeezed out of the kernel.
        out_specs=pl.BlockSpec((None, 1, tile_b), lambda i: (i, 0, 0)),
        compiler_params=pltpu.CompilerParams(
            dimension_semantics=("parallel",),   # shard batch tiles across TCs
            vmem_limit_bytes=48 * 1024 * 1024,   # > v5e's 16 MiB default scope
        ),
    )(x, w1_bf16, b1_row, w2_row, b2_s)

    # (num_tiles, 1, tile_b) flattens in exact batch order; drop masked tail rows.
    return out.reshape(-1)[:B].reshape(B, 1)


def init_params(key):
    """Deterministic init mimicking PyTorch nn.Linear defaults (uniform ±1/sqrt(fan_in))."""
    k1, k2, k3, k4 = jax.random.split(key, 4)
    lim1 = 1.0 / jnp.sqrt(jnp.float32(IMG_DIM))
    lim2 = 1.0 / jnp.sqrt(jnp.float32(HIDDEN))
    w1 = jax.random.uniform(k1, (IMG_DIM, HIDDEN), jnp.float32, -lim1, lim1)
    b1 = jax.random.uniform(k2, (HIDDEN,), jnp.float32, -lim1, lim1)
    w2 = jax.random.uniform(k3, (HIDDEN, 1), jnp.float32, -lim2, lim2)
    b2 = jax.random.uniform(k4, (1,), jnp.float32, -lim2, lim2)
    return w1, b1, w2, b2


def reference_forward(x, w1, b1, w2, b2):
    h = x @ w1 + b1
    h = jnp.where(h > 0, h, 0.1 * h)
    z = h @ w2 + b2
    return jax.nn.sigmoid(z)


if __name__ == "__main__":
    key = jax.random.PRNGKey(0)
    kx, kp = jax.random.split(key)
    w1, b1, w2, b2 = init_params(kp)

    # Single full tile (the >=2-tile cap collapses to one 128-row tile here).
    B = 128
    x = jax.random.normal(kx, (B, IMG_DIM), jnp.float32)
    out = jax.block_until_ready(discriminator_forward(x, w1, b1, w2, b2))
    ref = reference_forward(x, w1, b1, w2, b2)
    assert out.shape == (B, 1)
    # bf16 MXU inputs + approx reciprocal -> loosened tolerance vs f32 reference.
    assert jnp.max(jnp.abs(out - ref)) < 2e-2, "mismatch vs pure-JAX reference (B=128)"

    # Ragged multi-tile batch: 2 grid steps, masked partial last block, no pad.
    B2 = 300
    x2 = jax.random.normal(jax.random.PRNGKey(1), (B2, IMG_DIM), jnp.float32)
    out2 = jax.block_until_ready(discriminator_forward(x2, w1, b1, w2, b2))
    ref2 = reference_forward(x2, w1, b1, w2, b2)
    assert out2.shape == (B2, 1)
    assert jnp.max(jnp.abs(out2 - ref2)) < 2e-2, "mismatch vs pure-JAX reference (B=300)"

    print("KERNEL_OK")
</pallas_src>

<mosaic_0001>
module attributes {stable_mosaic.version = 11 : i64} {
  func.func @disc_kernel(%arg0: i32, %arg1: memref<128x784xf32, #tpu.memory_space<vmem>>, %arg2: memref<784x128xbf16, #tpu.memory_space<vmem>>, %arg3: memref<1x128xf32, #tpu.memory_space<vmem>>, %arg4: memref<1x128xf32, #tpu.memory_space<vmem>>, %arg5: memref<1x1xf32, #tpu.memory_space<smem>>, %arg6: memref<1x1x128xf32, #tpu.memory_space<vmem>>) attributes {dimension_semantics = [#tpu.dimension_semantics<parallel>], iteration_bounds = array<i64: 1>, scalar_prefetch = 0 : i64, scratch_operands = 0 : i64, tpu.core_type = #tpu.core_type<tc>, window_params = [{transform_indices = @transform_0, window_bounds = array<i64: 128, 784>}, {pipeline_mode = #tpu.pipeline_mode<synchronous>, transform_indices = @transform_1, window_bounds = array<i64: 784, 128>}, {pipeline_mode = #tpu.pipeline_mode<synchronous>, transform_indices = @transform_2, window_bounds = array<i64: 1, 128>}, {pipeline_mode = #tpu.pipeline_mode<synchronous>, transform_indices = @transform_3, window_bounds = array<i64: 1, 128>}, {transform_indices = @transform_4, window_bounds = array<i64: 1, 1>}, {transform_indices = @transform_5, window_bounds = array<i64: 1, 1, 128>}]} {
    %c0 = arith.constant 0 : index
    %c0_0 = arith.constant 0 : index
    %0 = vector.load %arg1[%c0, %c0_0] : memref<128x784xf32, #tpu.memory_space<vmem>>, vector<128x784xf32>
    %1 = arith.truncf %0 : vector<128x784xf32> to vector<128x784xbf16>
    %c0_1 = arith.constant 0 : index
    %c0_2 = arith.constant 0 : index
    %2 = vector.load %arg2[%c0_1, %c0_2] : memref<784x128xbf16, #tpu.memory_space<vmem>>, vector<784x128xbf16>
    %cst = arith.constant dense<0.000000e+00> : vector<128x128xf32>
    %3 = tpu.matmul %1, %2, %cst {dimension_numbers = #tpu.dot_dimension_numbers<[1], [0], [0], [1], [0, 0, 1, 1], [], []>} : vector<128x784xbf16>, vector<784x128xbf16>, vector<128x128xf32> -> vector<128x128xf32>
    %c0_3 = arith.constant 0 : index
    %c0_4 = arith.constant 0 : index
    %4 = vector.load %arg3[%c0_3, %c0_4] : memref<1x128xf32, #tpu.memory_space<vmem>>, vector<1x128xf32>
    %5 = vector.broadcast %4 : vector<1x128xf32> to vector<128x128xf32>
    %6 = arith.addf %3, %5 : vector<128x128xf32>
    %cst_5 = arith.constant 0.000000e+00 : f32
    %7 = vector.broadcast %cst_5 : f32 to vector<128x128xf32>
    %8 = arith.cmpf ogt, %6, %7 : vector<128x128xf32>
    %cst_6 = arith.constant 1.000000e-01 : f32
    %9 = vector.broadcast %cst_6 : f32 to vector<128x128xf32>
    %10 = arith.mulf %9, %6 : vector<128x128xf32>
    %11 = arith.select %8, %6, %10 : vector<128x128xi1>, vector<128x128xf32>
    %c0_7 = arith.constant 0 : index
    %c0_8 = arith.constant 0 : index
    %12 = vector.load %arg4[%c0_7, %c0_8] : memref<1x128xf32, #tpu.memory_space<vmem>>, vector<1x128xf32>
    %13 = vector.broadcast %12 : vector<1x128xf32> to vector<128x128xf32>
    %14 = arith.mulf %11, %13 : vector<128x128xf32>
    %15 = tpu.transpose %14, [1, 0] : vector<128x128xf32> -> vector<128x128xf32>
    %cst_9 = arith.constant dense<0.000000e+00> : vector<128xf32>
    %16 = vector.multi_reduction <add>, %15, %cst_9 [0] : vector<128x128xf32> to vector<128xf32>
    %17 = vector.shape_cast %16 : vector<128xf32> to vector<1x128xf32>
    %c0_10 = arith.constant 0 : index
    %c0_11 = arith.constant 0 : index
    %18 = memref.load %arg5[%c0_10, %c0_11] : memref<1x1xf32, #tpu.memory_space<smem>>
    %19 = vector.broadcast %18 : f32 to vector<1x128xf32>
    %20 = arith.addf %17, %19 : vector<1x128xf32>
    %cst_12 = arith.constant 0.000000e+00 : f32
    %21 = vector.broadcast %cst_12 : f32 to vector<1x128xf32>
    %22 = arith.subf %21, %20 : vector<1x128xf32>
    %23 = math.exp %22 : vector<1x128xf32>
    %cst_13 = arith.constant 1.000000e+00 : f32
    %24 = vector.broadcast %cst_13 : f32 to vector<1x128xf32>
    %25 = arith.addf %24, %23 : vector<1x128xf32>
    %26 = tpu.reciprocal %25 {approx = true} : vector<1x128xf32> -> vector<1x128xf32>
    %c0_14 = arith.constant 0 : index
    %c0_15 = arith.constant 0 : index
    %c0_16 = arith.constant 0 : index
    %27 = vector.load %arg6[%c0_14, %c0_15, %c0_16] : memref<1x1x128xf32, #tpu.memory_space<vmem>>, vector<1x1x128xf32>
    %28 = vector.shape_cast %27 : vector<1x1x128xf32> to vector<1x128xf32>
    %29 = vector.shape_cast %26 : vector<1x128xf32> to vector<1x1x128xf32>
    tpu.vector_store %arg6[%c0_14, %c0_15, %c0_16], %29 {strides = array<i32>} : memref<1x1x128xf32, #tpu.memory_space<vmem>>, vector<1x1x128xf32>,
    return
  }
  func.func @transform_0(%arg0: i32) -> (i32, i32) {
    %c0_i32 = arith.constant 0 : i32
    %c0_i32_0 = arith.constant 0 : i32
    return %arg0, %c0_i32 : i32, i32
  }
  func.func @transform_1(%arg0: i32) -> (i32, i32) {
    %c0_i32 = arith.constant 0 : i32
    %c0_i32_0 = arith.constant 0 : i32
    %c0_i32_1 = arith.constant 0 : i32
    return %c0_i32, %c0_i32_0 : i32, i32
  }
  func.func @transform_2(%arg0: i32) -> (i32, i32) {
    %c0_i32 = arith.constant 0 : i32
    %c0_i32_0 = arith.constant 0 : i32
    %c0_i32_1 = arith.constant 0 : i32
    return %c0_i32, %c0_i32_0 : i32, i32
  }
  func.func @transform_3(%arg0: i32) -> (i32, i32) {
    %c0_i32 = arith.constant 0 : i32
    %c0_i32_0 = arith.constant 0 : i32
    %c0_i32_1 = arith.constant 0 : i32
    return %c0_i32, %c0_i32_0 : i32, i32
  }
  func.func @transform_4(%arg0: i32) -> (i32, i32) {
    %c0_i32 = arith.constant 0 : i32
    %c0_i32_0 = arith.constant 0 : i32
    %c0_i32_1 = arith.constant 0 : i32
    return %c0_i32, %c0_i32_0 : i32, i32
  }
  func.func @transform_5(%arg0: i32) -> (i32, i32, i32) {
    %c0_i32 = arith.constant 0 : i32
    %c0_i32_0 = arith.constant 0 : i32
    %c0_i32_1 = arith.constant 0 : i32
    return %arg0, %c0_i32, %c0_i32_0 : i32, i32, i32
  }
}

</mosaic_0001>

<bundles_post_ra>
// kernel: discriminator_forward.1
= control target key start
LH: loop header
LB: loop body
LE: loop exit
PB: predicated region body
PF: predicated region fallthrough
CT: control target
= control target key end

     0   :  { %s2149_s0 = inlined_call_operand.vmem [shape: f32[128,784], index: 0, kind: input, shape index: {}]   ;;  %s2150_s1 = inlined_call_operand.vmem [shape: bf16[784,128], index: 1, kind: input, shape index: {}]   ;;  %s2151_s2 = inlined_call_operand.vmem [shape: f32[1,128], index: 2, kind: input, shape index: {}]   ;;  %s2152_s3 = inlined_call_operand.vmem [shape: f32[1,128], index: 3, kind: input, shape index: {}]   ;;  %s2153_s4 = inlined_call_operand.<no memory space> [shape: f32[1,1], index: 4, kind: input, shape index: {}]   ;;  %s2154_s5 = inlined_call_operand.hbm [shape: f32[1,1,128], index: 5, kind: output, shape index: {}]  }
   0x1   :  { %v1445_v0 = vld [vmem:[%s2150_s1 + $0x40] sm:$0xff]   ;;  %v1449_v4 = vld [vmem:[%s2150_s1 + $0x48] sm:$0xff]   ;;  %v1453_v8 = vld [vmem:[%s2150_s1 + $0x50] sm:$0xff]  }
   0x2   :  { %v1446_v1 = vld [vmem:[%s2150_s1 + $0xc0] sm:$0xff]   ;;  %1209 = vmatprep.subr.bf16.mxu0 %v1445_v0  ;;  %v1450_v5 = vld [vmem:[%s2150_s1 + $0xc8] sm:$0xff]   ;;  %v1454_v9 = vld [vmem:[%s2150_s1 + $0xd0] sm:$0xff]  }
   0x3   :  { %v1447_v2 = vld [vmem:[%s2150_s1] sm:$0xff]   ;;  %1273 = vmatprep.subr.bf16.mxu1 %v1446_v1  ;;  %v1451_v6 = vld [vmem:[%s2150_s1 + $0x8] sm:$0xff]   ;;  %v1455_v10 = vld [vmem:[%s2150_s1 + $0x10] sm:$0xff]  }
   0x4   :  { %v1448_v3 = vld [vmem:[%s2150_s1 + $0x80] sm:$0xff]   ;;  %1210 = vmatpush3.bf16.msra.mxu0 %v1447_v2  ;;  %v1452_v7 = vld [vmem:[%s2150_s1 + $0x88] sm:$0xff]   ;;  %v1456_v11 = vld [vmem:[%s2150_s1 + $0x90] sm:$0xff]  }
   0x5   :  { %1274 = vmatpush3.bf16.msra.mxu1 %v1448_v3  ;;  %1211 = vmatprep.subr.bf16.mxu0 %v1449_v4  ;;  %v1457_v12 = vld [vmem:[%s2150_s1 + $0x58] sm:$0xff]   ;;  %v1461_v16 = vld [vmem:[%s2150_s1 + $0x60] sm:$0xff]   ;;  %v1465_v20 = vld [vmem:[%s2150_s1 + $0x68] sm:$0xff]  }
   0x6   :  { %1275 = vmatprep.subr.bf16.mxu1 %v1450_v5  ;;  %v1458_v13 = vld [vmem:[%s2150_s1 + $0xd8] sm:$0xff]   ;;  %v1462_v17 = vld [vmem:[%s2150_s1 + $0xe0] sm:$0xff]   ;;  %v1466_v21 = vld [vmem:[%s2150_s1 + $0xe8] sm:$0xff]  }
   0x7   :  { %v1459_v14 = vld [vmem:[%s2150_s1 + $0x18] sm:$0xff]   ;;  %v1463_v18 = vld [vmem:[%s2150_s1 + $0x20] sm:$0xff]   ;;  %v1467_v22 = vld [vmem:[%s2150_s1 + $0x28] sm:$0xff]  }
   0x8   :  { %1212 = vmatpush3.bf16.msra.mxu0 %v1451_v6  ;;  %v1460_v15 = vld [vmem:[%s2150_s1 + $0x98] sm:$0xff]   ;;  %v1464_v19 = vld [vmem:[%s2150_s1 + $0xa0] sm:$0xff]   ;;  %v1468_v23 = vld [vmem:[%s2150_s1 + $0xa8] sm:$0xff]  }
   0x9   :  { %1276 = vmatpush3.bf16.msra.mxu1 %v1452_v7  ;;  %1213 = vmatprep.subr.bf16.mxu0 %v1453_v8  ;;  %v1469_v24 = vld [vmem:[%s2150_s1 + $0x70] sm:$0xff]   ;;  %v1473_v28 = vld [vmem:[%s2150_s1 + $0x78] sm:$0xff]   ;;  %v24_v32 = vld [vmem:[%s2149_s0 + $0x8] sm:$0xff] }
   0xa   :  { %1277 = vmatprep.subr.bf16.mxu1 %v1454_v9  ;;  %v1470_v25 = vld [vmem:[%s2150_s1 + $0xf0] sm:$0xff]   ;;  %v1474_v29 = vld [vmem:[%s2150_s1 + $0xf8] sm:$0xff]   ;;  %v31_v33 = vld [vmem:[%s2149_s0 + $0x40] sm:$0xff] }
   0xb   :  { %v1471_v26 = vld [vmem:[%s2150_s1 + $0x30] sm:$0xff]   ;;  %v1475_v30 = vld [vmem:[%s2150_s1 + $0x38] sm:$0xff]   ;;  %v136_v35 = vpack.c.bf16 %v31_v33, %v24_v32  ;;  %v23_v37 = vld [vmem:[%s2149_s0] sm:$0xff] }
   0xc   :  { %1214 = vmatpush3.bf16.msra.mxu0 %v1455_v10  ;;  %v1472_v27 = vld [vmem:[%s2150_s1 + $0xb0] sm:$0xff]   ;;  %v1476_v31 = vld [vmem:[%s2150_s1 + $0xb8] sm:$0xff]   ;;  %v32_v42 = vld [vmem:[%s2149_s0 + $0x48] sm:$0xff] }
   0xd   :  { %1278 = vmatpush3.bf16.msra.mxu1 %v1456_v11  ;;  %1215 = vmatprep.subr.bf16.mxu0 %v1457_v12  ;;  %v26_v34 = vld [vmem:[%s2149_s0 + $0x18] sm:$0xff]  ;;  %v33_v36 = vld [vmem:[%s2149_s0 + $0x50] sm:$0xff]  ;;  %v1477_v44 = vld [vmem:[%s2150_s1 + $0x140] sm:$0xff]  }
   0xe   :  { %1279 = vmatprep.subr.bf16.mxu1 %v1458_v13  ;;  %v30_v38 = vld [vmem:[%s2149_s0 + $0x38] sm:$0xff]  ;;  %v138_v39 = vpack.c.bf16 %v33_v36, %v26_v34  ;;  %v25_v41 = vld [vmem:[%s2149_s0 + $0x10] sm:$0xff]  ;;  %647 = vmatprep.mubr.bf16.mxu0 %v136_v35  ;;  %v1478_v45 = vld [vmem:[%s2150_s1 + $0x100] sm:$0xff]  }
   0xf   :  { %v135_v40 = vpack.c.bf16 %v30_v38, %v23_v37  ;;  %v137_v43 = vpack.c.bf16 %v32_v42, %v25_v41  ;;  %v38_v46 = vld [vmem:[%s2149_s0 + $0x78] sm:$0xff]  ;;  %v45_v47 = vld [vmem:[%s2149_s0 + $0xb0] sm:$0xff]  ;;  %v40_v48 = vld [vmem:[%s2149_s0 + $0x88] sm:$0xff] }
  0x10   :  { %1216 = vmatpush3.bf16.msra.mxu0 %v1459_v14  ;;  %744 = vmatprep.mubr.bf16.mxu1 %v138_v39  ;;  %v47_v49 = vld [vmem:[%s2149_s0 + $0xc0] sm:$0xff]  ;;  %v143_v50 = vpack.c.bf16 %v45_v47, %v38_v46  ;;  %v37_v52 = vld [vmem:[%s2149_s0 + $0x70] sm:$0xff]  ;;  %v44_v53 = vld [vmem:[%s2149_s0 + $0xa8] sm:$0xff] }
  0x11   :  { %1280 = vmatpush3.bf16.msra.mxu1 %v1460_v15  ;;  %1217 = vmatprep.subr.bf16.mxu0 %v1461_v16  ;;  %v145_v51 = vpack.c.bf16 %v47_v49, %v40_v48  ;;  %v39_v54 = vld [vmem:[%s2149_s0 + $0x80] sm:$0xff]  ;;  %v46_v55 = vld [vmem:[%s2149_s0 + $0xb8] sm:$0xff]  ;;  %v142_v56 = vpack.c.bf16 %v44_v53, %v37_v52  ;;  %v1479_v57 = vld [vmem:[%s2150_s1 + $0x148] sm:$0xff]  }
  0x12   :  { %1281 = vmatprep.subr.bf16.mxu1 %v1462_v17  ;;  %v144_v58 = vpack.c.bf16 %v46_v55, %v39_v54  ;;  %v1480_v59 = vld [vmem:[%s2150_s1 + $0x108] sm:$0xff]   ;;  %v59_v61 = vld [vmem:[%s2149_s0 + $0x120] sm:$0xff]  ;;  %v54_v63 = vld [vmem:[%s2149_s0 + $0xf8] sm:$0xff] }
  0x13   :  { %v52_v60 = vld [vmem:[%s2149_s0 + $0xe8] sm:$0xff]  ;;  %v61_v0 = vld [vmem:[%s2149_s0 + $0x130] sm:$0xff]  ;;  %v51_v2 = vld [vmem:[%s2149_s0 + $0xe0] sm:$0xff] }
  0x14   :  { %1218 = vmatpush3.bf16.msra.mxu0 %v1463_v18  ;;  %v150_v62 = vpack.c.bf16 %v59_v61, %v52_v60  ;;  %v152_v1 = vpack.c.bf16 %v61_v0, %v54_v63  ;;  %v58_v3 = vld [vmem:[%s2149_s0 + $0x118] sm:$0xff]  ;;  %v53_v4 = vld [vmem:[%s2149_s0 + $0xf0] sm:$0xff]  ;;  %v60_v7 = vld [vmem:[%s2149_s0 + $0x128] sm:$0xff] }
  0x15   :  { %1282 = vmatpush3.bf16.msra.mxu1 %v1464_v19  ;;  %1219 = vmatprep.subr.bf16.mxu0 %v1465_v20  ;;  %v1481_v5 = vld [vmem:[%s2150_s1 + $0x150] sm:$0xff]   ;;  %v66_v8 = vld [vmem:[%s2149_s0 + $0x158] sm:$0xff]  ;;  %v68_v10 = vld [vmem:[%s2149_s0 + $0x168] sm:$0xff]  ;;  %v149_v12 = vpack.c.bf16 %v58_v3, %v51_v2  ;;  %v151_v13 = vpack.c.bf16 %v60_v7, %v53_v4 }
  0x16   :  { %1283 = vmatprep.subr.bf16.mxu1 %v1466_v21  ;;  %v1482_v6 = vld [vmem:[%s2150_s1 + $0x110] sm:$0xff]   ;;  %v75_v11 = vld [vmem:[%s2149_s0 + $0x1a0] sm:$0xff]  ;;  %v1483_v15 = vld [vmem:[%s2150_s1 + $0x158] sm:$0xff]  }
  0x17   :  { %v73_v9 = vld [vmem:[%s2149_s0 + $0x190] sm:$0xff]  ;;  %v159_v16 = vpack.c.bf16 %v75_v11, %v68_v10  ;;  %v1484_v17 = vld [vmem:[%s2150_s1 + $0x118] sm:$0xff]   ;;  %v72_v19 = vld [vmem:[%s2149_s0 + $0x188] sm:$0xff] }
  0x18   :  { %1220 = vmatpush3.bf16.msra.mxu0 %v1467_v22  ;;  %v157_v14 = vpack.c.bf16 %v73_v9, %v66_v8  ;;  %v65_v18 = vld [vmem:[%s2149_s0 + $0x150] sm:$0xff]  ;;  %v67_v20 = vld [vmem:[%s2149_s0 + $0x160] sm:$0xff]  ;;  %v74_v21 = vld [vmem:[%s2149_s0 + $0x198] sm:$0xff] }
  0x19   :  { %1284 = vmatpush3.bf16.msra.mxu1 %v1468_v23  ;;  %1221 = vmatprep.subr.bf16.mxu0 %v1469_v24  ;;  %v80_v22 = vld [vmem:[%s2149_s0 + $0x1c8] sm:$0xff]  ;;  %v87_v23 = vld [vmem:[%s2149_s0 + $0x200] sm:$0xff]  ;;  %v86_v35 = vld [vmem:[%s2149_s0 + $0x1f8] sm:$0xff] }
  0x1a   :  { %1285 = vmatprep.subr.bf16.mxu1 %v1470_v25  ;;  %v1485_v24 = vld [vmem:[%s2150_s1 + $0x160] sm:$0xff]   ;;  %v82_v25 = vld [vmem:[%s2149_s0 + $0x1d8] sm:$0xff]  ;;  %v1487_v32 = vld [vmem:[%s2150_s1 + $0x168] sm:$0xff]  }
  0x1b   :  { %v1488_v33 = vld [vmem:[%s2150_s1 + $0x128] sm:$0xff]   ;;  %v79_v34 = vld [vmem:[%s2149_s0 + $0x1c0] sm:$0xff]  ;;  %v81_v36 = vld [vmem:[%s2149_s0 + $0x1d0] sm:$0xff] }
  0x1c   :  { %1222 = vmatpush3.bf16.msra.mxu0 %v1471_v26  ;;  %v89_v26 = vld [vmem:[%s2149_s0 + $0x210] sm:$0xff]  ;;  %v88_v37 = vld [vmem:[%s2149_s0 + $0x208] sm:$0xff]  ;;  %v94_v38 = vld [vmem:[%s2149_s0 + $0x238] sm:$0xff] }
  0x1d   :  { %1286 = vmatpush3.bf16.msra.mxu1 %v1472_v27  ;;  %1223 = vmatprep.subr.bf16.mxu0 %v1473_v28  ;;  %v1486_v27 = vld [vmem:[%s2150_s1 + $0x120] sm:$0xff]   ;;  %v156_v28 = vpack.c.bf16 %v72_v19, %v65_v18  ;;  %v101_v39 = vld [vmem:[%s2149_s0 + $0x270] sm:$0xff]  ;;  %v1491_v49 = vld [vmem:[%s2150_s1 + $0x178] sm:$0xff]  }
  0x1e   :  { %1287 = vmatprep.subr.bf16.mxu1 %v1474_v29  ;;  %v158_v29 = vpack.c.bf16 %v74_v21, %v67_v20  ;;  %v103_v41 = vld [vmem:[%s2149_s0 + $0x280] sm:$0xff]  ;;  %v1489_v42 = vld [vmem:[%s2150_s1 + $0x170] sm:$0xff]   ;;  %v171_v46 = vpack.c.bf16 %v101_v39, %v94_v38  ;;  %v1492_v52 = vld [vmem:[%s2150_s1 + $0x138] sm:$0xff]  }
  0x1f   :  { %v93_v48 = vld [vmem:[%s2149_s0 + $0x230] sm:$0xff]  ;;  %v102_v53 = vld [vmem:[%s2149_s0 + $0x278] sm:$0xff]  ;;  %v108_v54 = vld [vmem:[%s2149_s0 + $0x2a8] sm:$0xff] }
  0x20   :  { %1224 = vmatpush3.bf16.msra.mxu0 %v1475_v30  ;;  %v164_v30 = vpack.c.bf16 %v87_v23, %v80_v22  ;;  %v115_v55 = vld [vmem:[%s2149_s0 + $0x2e0] sm:$0xff]  ;;  %v114_v0 = vld [vmem:[%s2149_s0 + $0x2d8] sm:$0xff]  ;;  %v116_v2 = vld [vmem:[%s2149_s0 + $0x2e8] sm:$0xff] }
  0x21   :  { %1288 = vmatpush3.bf16.msra.mxu1 %v1476_v31  ;;  %1337 = vmatprep.subr.bf16.mxu0 %v1477_v44  ;;  %v166_v31 = vpack.c.bf16 %v89_v26, %v82_v25  ;;  %v178_v61 = vpack.c.bf16 %v115_v55, %v108_v54  ;;  %v107_v63 = vld [vmem:[%s2149_s0 + $0x2a0] sm:$0xff]  ;;  %v122_v3 = vld [vmem:[%s2149_s0 + $0x318] sm:$0xff]  ;;  %v129_v4 = vld [vmem:[%s2149_s0 + $0x350] sm:$0xff] }
  0x22   :  { %1428 = vmatprep.subr.bf16.mxu1 %v1477_v44  ;;  %v1490_v44 = vld [vmem:[%s2150_s1 + $0x130] sm:$0xff]   ;;  %v177_v7 = vpack.c.bf16 %v114_v0, %v107_v63  ;;  %v185_v9 = vpack.c.bf16 %v129_v4, %v122_v3 }
  0x23   :  { %648 = vmatmul.mubr.bf16.vlgmr.msra.gmra.mrb[0].mxu0 %v135_v40  ;;  %v96_v40 = vld [vmem:[%s2149_s0 + $0x248] sm:$0xff]  ;;  %v121_v11 = vld [vmem:[%s2149_s0 + $0x310] sm:$0xff] }
  0x24   :  { %745 = vmatmul.mubr.bf16.vlgmr.msra.gmra.mrb[0].mxu1 %v137_v43  ;;  %1338 = vmatpush3.bf16.msra.mxu0 %v1478_v45  ;;  %v163_v43 = vpack.c.bf16 %v86_v35, %v79_v34  ;;  %v173_v47 = vpack.c.bf16 %v103_v41, %v96_v40 }
  0x25   :  { %1436 = vmatpush3.bf16.msra.mxu1 %v1478_v45  ;;  %655 = vmatprep.mubr.bf16.mxu0 %v143_v50  ;;  %v165_v45 = vpack.c.bf16 %v88_v37, %v81_v36  ;;  %v100_v50 = vld [vmem:[%s2149_s0 + $0x268] sm:$0xff] }
  0x26   :  { %752 = vmatprep.mubr.bf16.mxu1 %v145_v51  ;;  %1429 = vmatprep.subr.bf16.mxu1 %v1479_v57  ;;  %v95_v51 = vld [vmem:[%s2149_s0 + $0x240] sm:$0xff] }
  0x27   :  { %1339 = vmatprep.subr.bf16.mxu0 %v1479_v57  ;;  %v117_v57 = vld [vmem:[%s2149_s0 + $0x2f0] sm:$0xff]  ;;  %v172_v60 = vpack.c.bf16 %v102_v53, %v95_v51 }
  0x28   :  { %1340 = vmatpush3.bf16.msra.mxu0 %v1480_v59 }
  0x29   :  { %1437 = vmatpush3.bf16.msra.mxu1 %v1480_v59  ;;  %1341 = vmatprep.subr.bf16.mxu0 %v1481_v5  ;;  %v1493_v59 = vld [vmem:[%s2150_s1 + $0x180] sm:$0xff]  }
  0x2a   :  { %1430 = vmatprep.subr.bf16.mxu1 %v1481_v5  ;;  %v124_v5 = vld [vmem:[%s2149_s0 + $0x328] sm:$0xff] }
  0x2b   :  { %656 = vmatmul.mubr.bf16.gmra.mrb[4].mxu0 %v142_v56  ;;  %v110_v56 = vld [vmem:[%s2149_s0 + $0x2b8] sm:$0xff] }
  0x2c   :  { %753 = vmatmul.mubr.bf16.gmra.mrb[4].mxu1 %v144_v58  ;;  %663 = vmatprep.mubr.bf16.mxu0 %v150_v62  ;;  %v170_v58 = vpack.c.bf16 %v100_v50, %v93_v48  ;;  %v180_v62 = vpack.c.bf16 %v117_v57, %v110_v56 }
  0x2d   :  { %760 = vmatprep.mubr.bf16.mxu1 %v152_v1  ;;  %1438 = vmatpush3.bf16.msra.mxu1 %v1482_v6  ;;  %v109_v1 = vld [vmem:[%s2149_s0 + $0x2b0] sm:$0xff] }
  0x2e   :  { %1342 = vmatpush3.bf16.msra.mxu0 %v1482_v6  ;;  %1431 = vmatprep.subr.bf16.mxu1 %v1483_v15  ;;  %v131_v6 = vld [vmem:[%s2149_s0 + $0x360] sm:$0xff]  ;;  %v179_v8 = vpack.c.bf16 %v116_v2, %v109_v1 }
  0x2f   :  { %1343 = vmatprep.subr.bf16.mxu0 %v1483_v15  ;;  %v187_v10 = vpack.c.bf16 %v131_v6, %v124_v5  ;;  %v28_v15 = vld [vmem:[%s2149_s0 + $0x28] sm:$0xff] }
  0x31   :  { %1439 = vmatpush3.bf16.msra.mxu1 %v1484_v17 }
  0x32   :  { %1344 = vmatpush3.bf16.msra.mxu0 %v1484_v17  ;;  %1432 = vmatprep.subr.bf16.mxu1 %v1485_v24 }
  0x33   :  { %664 = vmatmul.mubr.bf16.gmra.mrb[8].mxu0 %v149_v12  ;;  %1345 = vmatprep.subr.bf16.mxu0 %v1485_v24  ;;  %v128_v12 = vld [vmem:[%s2149_s0 + $0x348] sm:$0xff] }
  0x34   :  { %761 = vmatmul.mubr.bf16.gmra.mrb[8].mxu1 %v151_v13  ;;  %671 = vmatprep.mubr.bf16.mxu0 %v157_v14  ;;  %v123_v13 = vld [vmem:[%s2149_s0 + $0x320] sm:$0xff]  ;;  %v130_v14 = vld [vmem:[%s2149_s0 + $0x358] sm:$0xff] }
  0x35   :  { %768 = vmatprep.mubr.bf16.mxu1 %v159_v16  ;;  %1440 = vmatpush3.bf16.msra.mxu1 %v1486_v27  ;;  %v35_v16 = vld [vmem:[%s2149_s0 + $0x60] sm:$0xff] }
  0x36   :  { %1346 = vmatpush3.bf16.msra.mxu0 %v1486_v27  ;;  %1433 = vmatprep.subr.bf16.mxu1 %v1487_v32 }
  0x37   :  { %1347 = vmatprep.subr.bf16.mxu0 %v1487_v32 }
  0x39   :  { %1441 = vmatpush3.bf16.msra.mxu1 %v1488_v33 }
  0x3a   :  { %1348 = vmatpush3.bf16.msra.mxu0 %v1488_v33  ;;  %1434 = vmatprep.subr.bf16.mxu1 %v1489_v42 }
  0x3b   :  { %672 = vmatmul.mubr.bf16.gmra.mrb[12].mxu0 %v156_v28  ;;  %1349 = vmatprep.subr.bf16.mxu0 %v1489_v42 }
  0x3c   :  { %769 = vmatmul.mubr.bf16.gmra.mrb[12].mxu1 %v158_v29  ;;  %679 = vmatprep.mubr.bf16.mxu0 %v164_v30 }
  0x3d   :  { %776 = vmatprep.mubr.bf16.mxu1 %v166_v31  ;;  %1442 = vmatpush3.bf16.msra.mxu1 %v1490_v44 }
  0x3e   :  { %1435 = vmatprep.subr.bf16.mxu1 %v1491_v49  ;;  %1350 = vmatpush3.bf16.msra.mxu0 %v1490_v44 }
  0x3f   :  { %1351 = vmatprep.subr.bf16.mxu0 %v1491_v49 }
  0x41   :  { %1443 = vmatpush3.bf16.msra.mxu1 %v1492_v52 }
  0x42   :  { %1410 = vmatprep.subr.bf16.mxu1 %v1493_v59  ;;  %1352 = vmatpush3.bf16.msra.mxu0 %v1492_v52 }
  0x43   :  { %680 = vmatmul.mubr.bf16.gmra.mrb[16].mxu0 %v163_v43 }
  0x44   :  { %777 = vmatmul.mubr.bf16.gmra.mrb[16].mxu1 %v165_v45  ;;  %687 = vmatprep.mubr.bf16.mxu0 %v171_v46 }
  0x45   :  { %784 = vmatprep.mubr.bf16.mxu1 %v173_v47 }
  0x4b   :  { %688 = vmatmul.mubr.bf16.gmra.mrb[20].mxu0 %v170_v58 }
  0x4c   :  { %785 = vmatmul.mubr.bf16.gmra.mrb[20].mxu1 %v172_v60  ;;  %695 = vmatprep.mubr.bf16.mxu0 %v178_v61 }
  0x4d   :  { %792 = vmatprep.mubr.bf16.mxu1 %v180_v62 }
  0x53   :  { %696 = vmatmul.mubr.bf16.gmra.mrb[24].mxu0 %v177_v7 }
  0x54   :  { %793 = vmatmul.mubr.bf16.gmra.mrb[24].mxu1 %v179_v8  ;;  %703 = vmatprep.mubr.bf16.mxu0 %v185_v9 }
  0x55   :  { %800 = vmatprep.mubr.bf16.mxu1 %v187_v10 }
  0x56   :  { %11 = vsyncpa [#allocation4], 0  ;;  %v112_v17 = vld [vmem:[%s2149_s0 + $0x2c8] sm:$0xff]  ;;  %v119_v18 = vld [vmem:[%s2149_s0 + $0x300] sm:$0xff]  ;;  %v184_v19 = vpack.c.bf16 %v128_v12, %v121_v11  ;;  %v186_v20 = vpack.c.bf16 %v130_v14, %v123_v13  ;;  %v140_v21 = vpack.c.bf16 %v35_v16, %v28_v15  ;;  %vm590_vm0 = vcmask 130048   ;;  %s1522_s13 = smov [#allocation3]  }
  0x57   :  { %v182_v22 = vpack.c.bf16 %v119_v18, %v112_v17  ;;  %v27_v23 = vld [vmem:[%s2149_s0 + $0x20] sm:$0xff]  ;;  %v34_v24 = vld [vmem:[%s2149_s0 + $0x58] sm:$0xff]  ;;  %v49_v28 = vld [vmem:[%s2149_s0 + $0xd0] sm:$0xff]  ;;  %s1142_s14 = sshll.u32 %s1522_s13, 4  ;;  %s1143_s14 = int_to_ptr.vmem [resolvable:$true] %s1142_s14 }
  0x58   :  { %v111_v25 = vld [vmem:[%s2149_s0 + $0x2c0] sm:$0xff]  ;;  %v118_v26 = vld [vmem:[%s2149_s0 + $0x2f8] sm:$0xff]  ;;  %v133_v30 = vld [vmem:[%s2149_s0 + $0x370] sm:$0xff]  ;;  %v139_v31 = vpack.c.bf16 %v34_v24, %v27_v23  ;;  %s1498_s15 = scalar_lea.vmem %s1143_s14, 16  ;;  %s1502_s16 = scalar_lea.vmem %s1143_s14, 32 }
  0x59   :  { %v42_v27 = vld [vmem:[%s2149_s0 + $0x98] sm:$0xff]  ;;  %v181_v32 = vpack.c.bf16 %v118_v26, %v111_v25  ;;  %v41_v35 = vld [vmem:[%s2149_s0 + $0x90] sm:$0xff]  ;;  %v48_v36 = vld [vmem:[%s2149_s0 + $0xc8] sm:$0xff]  ;;  %p1499_p0 = scmp.ne.s32.totalorder %s1143_s14, %s1498_s15  ;;  %p1503_p1 = scmp.lt.s32.totalorder %s1143_s14, %s1143_s14 }
  0x5a   :  { %v126_v29 = vld [vmem:[%s2149_s0 + $0x338] sm:$0xff]  ;;  %v147_v33 = vpack.c.bf16 %v49_v28, %v42_v27  ;;  %v125_v37 = vld [vmem:[%s2149_s0 + $0x330] sm:$0xff]  ;;  %v132_v38 = vld [vmem:[%s2149_s0 + $0x368] sm:$0xff]  ;;  %v146_v43 = vpack.c.bf16 %v48_v36, %v41_v35  ;;  %p1504_p2 = scmp.lt.s32.totalorder %s1502_s16, %s1498_s15 }
  0x5b   :  { %704 = vmatmul.mubr.bf16.gmra.mrb[28].mxu0 %v184_v19  ;;  %v189_v34 = vpack.c.bf16 %v133_v30, %v126_v29  ;;  %v56_v39 = vld [vmem:[%s2149_s0 + $0x108] sm:$0xff]  ;;  %v63_v40 = vld [vmem:[%s2149_s0 + $0x140] sm:$0xff]  ;;  %v29_v41 = vld [vmem:[%s2149_s0 + $0x30] sm:$0xff]  ;;  %v188_v44 = vpack.c.bf16 %v132_v38, %v125_v37 }
  0x5c   :  { %801 = vmatmul.mubr.bf16.gmra.mrb[28].mxu1 %v186_v20  ;;  %841 = vmatprep.mubr.bf16.mxu0 %v140_v21  ;;  %v36_v42 = vld [vmem:[%s2149_s0 + $0x68] sm:$0xff]  ;;  %v154_v45 = vpack.c.bf16 %v63_v40, %v56_v39  ;;  %v55_v47 = vld [vmem:[%s2149_s0 + $0x100] sm:$0xff]  ;;  %v62_v48 = vld [vmem:[%s2149_s0 + $0x138] sm:$0xff]  ;;  %p1505_p3 = por %p1504_p2, %p1503_p1 }
  0x5d   :  { %889 = vmatprep.mubr.bf16.mxu1 %v182_v22  ;;  %v141_v46 = vpack.c.bf16 %v36_v42, %v29_v41  ;;  %v43_v49 = vld [vmem:[%s2149_s0 + $0xa0] sm:$0xff]  ;;  %v50_v50 = vld [vmem:[%s2149_s0 + $0xd8] sm:$0xff]  ;;  %v77_v52 = vld [vmem:[%s2149_s0 + $0x1b0] sm:$0xff]  ;;  %v153_v55 = vpack.c.bf16 %v62_v48, %v55_v47 }
  0x5e   :  { %v70_v51 = vld [vmem:[%s2149_s0 + $0x178] sm:$0xff]  ;;  %v57_v53 = vld [vmem:[%s2149_s0 + $0x110] sm:$0xff]  ;;  %v64_v54 = vld [vmem:[%s2149_s0 + $0x148] sm:$0xff]  ;;  %v148_v56 = vpack.c.bf16 %v50_v50, %v43_v49  ;;  %p1506_p4 = pnand %p1505_p3, %p1499_p0 }
  0x5f   :  { %v161_v57 = vpack.c.bf16 %v77_v52, %v70_v51  ;;  %v155_v58 = vpack.c.bf16 %v64_v54, %v57_v53  ;;  %v76_v60 = vld [vmem:[%s2149_s0 + $0x1a8] sm:$0xff]  ;;  %v71_v61 = vld [vmem:[%s2149_s0 + $0x180] sm:$0xff]  ;;  %v78_v62 = vld [vmem:[%s2149_s0 + $0x1b8] sm:$0xff] }
  0x60   :  { %v84_v63 = vld [vmem:[%s2149_s0 + $0x1e8] sm:$0xff]  ;;  %v91_v0 = vld [vmem:[%s2149_s0 + $0x220] sm:$0xff]  ;;  %v85_v1 = vld [vmem:[%s2149_s0 + $0x1f0] sm:$0xff]  ;;  %v162_v4 = vpack.c.bf16 %v78_v62, %v71_v61 }
  0x61   :  { %v92_v2 = vld [vmem:[%s2149_s0 + $0x228] sm:$0xff]  ;;  %v168_v5 = vpack.c.bf16 %v91_v0, %v84_v63  ;;  %v83_v7 = vld [vmem:[%s2149_s0 + $0x1e0] sm:$0xff]  ;;  %v90_v8 = vld [vmem:[%s2149_s0 + $0x218] sm:$0xff] }
  0x62   :  { %v169_v6 = vpack.c.bf16 %v92_v2, %v85_v1  ;;  %v99_v9 = vld [vmem:[%s2149_s0 + $0x260] sm:$0xff]  ;;  %v106_v10 = vld [vmem:[%s2149_s0 + $0x298] sm:$0xff]  ;;  %v105_v12 = vld [vmem:[%s2149_s0 + $0x290] sm:$0xff]  ;;  %v167_v15 = vpack.c.bf16 %v90_v8, %v83_v7 }
  0x63   :  { %842 = vmatmul.mubr.bf16.vlgmr.msra.gmra.mrb[32].mxu0 %v139_v31  ;;  %v98_v11 = vld [vmem:[%s2149_s0 + $0x258] sm:$0xff]  ;;  %v113_v13 = vld [vmem:[%s2149_s0 + $0x2d0] sm:$0xff]  ;;  %v120_v14 = vld [vmem:[%s2149_s0 + $0x308] sm:$0xff]  ;;  %v176_v16 = vpack.c.bf16 %v106_v10, %v99_v9 }
  0x64   :  { %890 = vmatmul.mubr.bf16.vlgmr.msra.gmra.mrb[32].mxu1 %v181_v32  ;;  %849 = vmatprep.mubr.bf16.mxu0 %v147_v33  ;;  %v175_v17 = vpack.c.bf16 %v105_v12, %v98_v11  ;;  %v183_v18 = vpack.c.bf16 %v120_v14, %v113_v13  ;;  %v97_v19 = vld [vmem:[%s2149_s0 + $0x250] sm:$0xff]  ;;  %v104_v20 = vld [vmem:[%s2149_s0 + $0x288] sm:$0xff]  ;;  %v127_v21 = vld [vmem:[%s2149_s0 + $0x340] sm:$0xff] }
  0x65   :  { %1411 = vmatpush3.bf16.msra.mxu1 %v1493_v59  ;;  %897 = vmatprep.mubr.bf16.mxu1 %v189_v34  ;;  %v69_v59 = vld [vmem:[%s2149_s0 + $0x170] sm:$0xff]  ;;  %v134_v22 = vld [vmem:[%s2149_s0 + $0x378] sm:$0xff]  ;;  %v174_v23 = vpack.c.bf16 %v104_v20, %v97_v19  ;;  %v2047_v27 = vld [vmem:[%s2151_s2] ss:$0 sm:$0xff] }
  0x66   :  { %v160_v3 = vpack.c.bf16 %v76_v60, %v69_v59  ;;  %v190_v24 = vpack.c.bf16 %v134_v22, %v127_v21 }
  0x6b   :  { %850 = vmatmul.mubr.bf16.gmra.mrb[36].mxu0 %v146_v43 }
  0x6c   :  { %898 = vmatmul.mubr.bf16.gmra.mrb[36].mxu1 %v188_v44  ;;  %857 = vmatprep.mubr.bf16.mxu0 %v154_v45 }
  0x6d   :  { %1412 = vmatprep.mubr.msk.bf16.mxu1 %vm590_vm0, %v141_v46 }
  0x73   :  { %858 = vmatmul.mubr.bf16.gmra.mrb[40].mxu0 %v153_v55 }
  0x74   :  { %1413 = vmatmul.mubr.msk.bf16.vlgmr.msra.gmra.mrb[40].mxu1 %vm590_vm0, %v148_v56  ;;  %865 = vmatprep.mubr.bf16.mxu0 %v161_v57 }
  0x75   :  { %1416 = vmatprep.mubr.msk.bf16.mxu1 %vm590_vm0, %v155_v58 }
  0x7b   :  { %866 = vmatmul.mubr.bf16.gmra.mrb[44].mxu0 %v160_v3 }
  0x7c   :  { %1417 = vmatmul.mubr.msk.bf16.gmra.mrb[44].mxu1 %vm590_vm0, %v162_v4  ;;  %873 = vmatprep.mubr.bf16.mxu0 %v168_v5 }
  0x7d   :  { %1420 = vmatprep.mubr.msk.bf16.mxu1 %vm590_vm0, %v169_v6 }
  0x83   :  { %874 = vmatmul.mubr.bf16.gmra.mrb[48].mxu0 %v167_v15 }
  0x84   :  { %1421 = vmatmul.mubr.msk.bf16.gmra.mrb[48].mxu1 %vm590_vm0, %v176_v16  ;;  %881 = vmatprep.mubr.bf16.mxu0 %v175_v17 }
  0x85   :  { %1424 = vmatprep.mubr.msk.bf16.mxu1 %vm590_vm0, %v183_v18 }
  0x8b   :  { %882 = vmatmul.mubr.bf16.gmra.mrb[52].mxu0 %v174_v23 }
  0x8c   :  { %1425 = vmatmul.mubr.msk.bf16.gmra.mrb[52].mxu1 %vm590_vm0, %v190_v24 }
  0xf6   :  { %v1225_v25 = vpop.f32.mrb[0].mxu0 }
  0xf7   :  { %v1289_v26 = vpop.f32.mrb[0].mxu1  ;;  %v1226_v28 = vpop.f32.mrb[1].mxu0 }
  0xf8   :  { %v1227_v29 = vadd.f32 %v1226_v28, %v1225_v25  ;;  %v1290_v30 = vpop.f32.mrb[1].mxu1  ;;  %v1228_v31 = vpop.f32.mrb[2].mxu0 }
  0xf9   :  { %v1291_v32 = vadd.f32 %v1290_v30, %v1289_v26  ;;  %v1292_v33 = vpop.f32.mrb[2].mxu1  ;;  %v1229_v34 = vpop.f32.mrb[3].mxu0 }
  0xfa   :  { %v650_v35 = vadd.f32 %v1227_v29, %v2047_v27  ;;  %v1230_v36 = vadd.f32 %v1229_v34, %v1228_v31  ;;  %v1293_v37 = vpop.f32.mrb[3].mxu1 }
  0xfb   :  { %v1294_v38 = vadd.f32 %v1293_v37, %v1292_v33 }
  0xfc   :  { %v2050_v39 = vadd.f32 %v1291_v32, %v650_v35  ;;  %v653_v40 = vadd.f32 %v1230_v36, %v2047_v27 }
  0xfe   :  { %v2053_v41 = vadd.f32 %v1294_v38, %v653_v40  ;;  %v1231_v42 = vpop.f32.mrb[4].mxu0 }
  0xff   :  { %v1295_v43 = vpop.f32.mrb[4].mxu1  ;;  %v1232_v44 = vpop.f32.mrb[5].mxu0 }
 0x100   :  { %v1233_v45 = vadd.f32 %v1232_v44, %v1231_v42  ;;  %v1296_v46 = vpop.f32.mrb[5].mxu1  ;;  %v1234_v47 = vpop.f32.mrb[6].mxu0 }
 0x101   :  { %v1297_v48 = vadd.f32 %v1296_v46, %v1295_v43  ;;  %v1298_v49 = vpop.f32.mrb[6].mxu1  ;;  %v1235_v50 = vpop.f32.mrb[7].mxu0 }
 0x102   :  { %v658_v51 = vadd.f32 %v1233_v45, %v2047_v27  ;;  %v1236_v52 = vadd.f32 %v1235_v50, %v1234_v47  ;;  %v1299_v53 = vpop.f32.mrb[7].mxu1 }
 0x103   :  { %v1300_v54 = vadd.f32 %v1299_v53, %v1298_v49 }
 0x104   :  { %v2056_v55 = vadd.f32 %v1297_v48, %v658_v51  ;;  %v661_v56 = vadd.f32 %v1236_v52, %v2047_v27 }
 0x106   :  { %v2059_v57 = vadd.f32 %v1300_v54, %v661_v56  ;;  %v1237_v58 = vpop.f32.mrb[8].mxu0 }
 0x107   :  { %v1301_v59 = vpop.f32.mrb[8].mxu1  ;;  %v1238_v60 = vpop.f32.mrb[9].mxu0 }
 0x108   :  { %v1239_v61 = vadd.f32 %v1238_v60, %v1237_v58  ;;  %v1302_v62 = vpop.f32.mrb[9].mxu1  ;;  %v1240_v63 = vpop.f32.mrb[10].mxu0 }
 0x109   :  { %v1303_v0 = vadd.f32 %v1302_v62, %v1301_v59  ;;  %v1304_v1 = vpop.f32.mrb[10].mxu1  ;;  %v1241_v2 = vpop.f32.mrb[11].mxu0 }
 0x10a   :  { %v666_v3 = vadd.f32 %v1239_v61, %v2047_v27  ;;  %v1242_v4 = vadd.f32 %v1241_v2, %v1240_v63  ;;  %v1305_v5 = vpop.f32.mrb[11].mxu1 }
 0x10b   :  { %v1306_v6 = vadd.f32 %v1305_v5, %v1304_v1 }
 0x10c   :  { %v2062_v7 = vadd.f32 %v1303_v0, %v666_v3  ;;  %v669_v8 = vadd.f32 %v1242_v4, %v2047_v27 }
 0x10e   :  { %v2065_v9 = vadd.f32 %v1306_v6, %v669_v8  ;;  %v1243_v10 = vpop.f32.mrb[12].mxu0 }
 0x10f   :  { %v1307_v11 = vpop.f32.mrb[12].mxu1  ;;  %v1244_v12 = vpop.f32.mrb[13].mxu0 }
 0x110   :  { %v1245_v13 = vadd.f32 %v1244_v12, %v1243_v10  ;;  %v1308_v14 = vpop.f32.mrb[13].mxu1  ;;  %v1246_v15 = vpop.f32.mrb[14].mxu0 }
 0x111   :  { %v1309_v16 = vadd.f32 %v1308_v14, %v1307_v11  ;;  %v1310_v17 = vpop.f32.mrb[14].mxu1  ;;  %v1247_v18 = vpop.f32.mrb[15].mxu0 }
 0x112   :  { %v674_v19 = vadd.f32 %v1245_v13, %v2047_v27  ;;  %v1248_v20 = vadd.f32 %v1247_v18, %v1246_v15  ;;  %v1311_v21 = vpop.f32.mrb[15].mxu1 }
 0x113   :  { %v1312_v22 = vadd.f32 %v1311_v21, %v1310_v17 }
 0x114   :  { %v2068_v23 = vadd.f32 %v1309_v16, %v674_v19  ;;  %v677_v24 = vadd.f32 %v1248_v20, %v2047_v27 }
 0x116   :  { %v2071_v25 = vadd.f32 %v1312_v22, %v677_v24  ;;  %v1249_v26 = vpop.f32.mrb[16].mxu0 }
 0x117   :  { %v1313_v28 = vpop.f32.mrb[16].mxu1  ;;  %v1250_v29 = vpop.f32.mrb[17].mxu0 }
 0x118   :  { %v1251_v30 = vadd.f32 %v1250_v29, %v1249_v26  ;;  %v1314_v31 = vpop.f32.mrb[17].mxu1  ;;  %v1252_v32 = vpop.f32.mrb[18].mxu0 }
 0x119   :  { %v1315_v33 = vadd.f32 %v1314_v31, %v1313_v28  ;;  %v1316_v34 = vpop.f32.mrb[18].mxu1  ;;  %v1253_v35 = vpop.f32.mrb[19].mxu0 }
 0x11a   :  { %v682_v36 = vadd.f32 %v1251_v30, %v2047_v27  ;;  %v1254_v37 = vadd.f32 %v1253_v35, %v1252_v32  ;;  %v1317_v38 = vpop.f32.mrb[19].mxu1 }
 0x11b   :  { %v1318_v40 = vadd.f32 %v1317_v38, %v1316_v34 }
 0x11c   :  { %v2074_v42 = vadd.f32 %v1315_v33, %v682_v36  ;;  %v685_v43 = vadd.f32 %v1254_v37, %v2047_v27 }
 0x11e   :  { %v2077_v44 = vadd.f32 %v1318_v40, %v685_v43  ;;  %v1255_v45 = vpop.f32.mrb[20].mxu0 }
 0x11f   :  { %v1319_v46 = vpop.f32.mrb[20].mxu1  ;;  %v1256_v47 = vpop.f32.mrb[21].mxu0 }
 0x120   :  { %v1257_v48 = vadd.f32 %v1256_v47, %v1255_v45  ;;  %v1320_v49 = vpop.f32.mrb[21].mxu1  ;;  %v1258_v50 = vpop.f32.mrb[22].mxu0 }
 0x121   :  { %v1321_v51 = vadd.f32 %v1320_v49, %v1319_v46  ;;  %v1322_v52 = vpop.f32.mrb[22].mxu1  ;;  %v1259_v53 = vpop.f32.mrb[23].mxu0 }
 0x122   :  { %v690_v54 = vadd.f32 %v1257_v48, %v2047_v27  ;;  %v1260_v56 = vadd.f32 %v1259_v53, %v1258_v50  ;;  %v1323_v58 = vpop.f32.mrb[23].mxu1 }
 0x123   :  { %v1324_v59 = vadd.f32 %v1323_v58, %v1322_v52 }
 0x124   :  { %v2080_v60 = vadd.f32 %v1321_v51, %v690_v54  ;;  %v693_v61 = vadd.f32 %v1260_v56, %v2047_v27 }
 0x126   :  { %v2083_v62 = vadd.f32 %v1324_v59, %v693_v61  ;;  %v1261_v63 = vpop.f32.mrb[24].mxu0 }
 0x127   :  { %v1325_v0 = vpop.f32.mrb[24].mxu1  ;;  %v1262_v1 = vpop.f32.mrb[25].mxu0 }
 0x128   :  { %v1263_v2 = vadd.f32 %v1262_v1, %v1261_v63  ;;  %v1326_v3 = vpop.f32.mrb[25].mxu1  ;;  %v1264_v4 = vpop.f32.mrb[26].mxu0 }
 0x129   :  { %v1327_v5 = vadd.f32 %v1326_v3, %v1325_v0  ;;  %v1328_v6 = vpop.f32.mrb[26].mxu1  ;;  %v1265_v8 = vpop.f32.mrb[27].mxu0 }
 0x12a   :  { %v698_v10 = vadd.f32 %v1263_v2, %v2047_v27  ;;  %v1266_v11 = vadd.f32 %v1265_v8, %v1264_v4  ;;  %v1329_v12 = vpop.f32.mrb[27].mxu1 }
 0x12b   :  { %v1330_v13 = vadd.f32 %v1329_v12, %v1328_v6 }
 0x12c   :  { %v795_v14 = vadd.f32 %v1327_v5, %v698_v10  ;;  %v701_v15 = vadd.f32 %v1266_v11, %v2047_v27 }
 0x12e   :  { %v798_v16 = vadd.f32 %v1330_v13, %v701_v15  ;;  %v1267_v17 = vpop.f32.mrb[28].mxu0 }
 0x12f   :  { %v1331_v18 = vpop.f32.mrb[28].mxu1  ;;  %v1268_v19 = vpop.f32.mrb[29].mxu0 }
 0x130   :  { %v1269_v20 = vadd.f32 %v1268_v19, %v1267_v17  ;;  %v1332_v21 = vpop.f32.mrb[29].mxu1  ;;  %v1270_v22 = vpop.f32.mrb[30].mxu0 }
 0x131   :  { %v1333_v24 = vadd.f32 %v1332_v21, %v1331_v18  ;;  %v1334_v26 = vpop.f32.mrb[30].mxu1  ;;  %v1271_v28 = vpop.f32.mrb[31].mxu0 }
 0x132   :  { %v706_v29 = vadd.f32 %v1269_v20, %v2047_v27  ;;  %v1272_v30 = vadd.f32 %v1271_v28, %v1270_v22  ;;  %v1335_v31 = vpop.f32.mrb[31].mxu1 }
 0x133   :  { %v1336_v32 = vadd.f32 %v1335_v31, %v1334_v26 }
 0x134   :  { %v803_v33 = vadd.f32 %v1333_v24, %v706_v29  ;;  %v709_v34 = vadd.f32 %v1272_v30, %v2047_v27 }
 0x136   :  { %v806_v35 = vadd.f32 %v1336_v32, %v709_v34  ;;  %v1353_v36 = vpop.f32.mrb[32].mxu0 }
 0x137   :  { %v1389_v37 = vpop.f32.mrb[32].mxu1  ;;  %v1354_v38 = vpop.f32.mrb[33].mxu0 }
 0x138   :  { %v1355_v40 = vadd.f32 %v1354_v38, %v1353_v36  ;;  %v1390_v43 = vpop.f32.mrb[33].mxu1  ;;  %v1356_v45 = vpop.f32.mrb[34].mxu0 }
 0x139   :  { %v1391_v46 = vadd.f32 %v1390_v43, %v1389_v37  ;;  %v1392_v47 = vpop.f32.mrb[34].mxu1  ;;  %v1357_v48 = vpop.f32.mrb[35].mxu0 }
 0x13a   :  { %v1358_v49 = vadd.f32 %v1357_v48, %v1356_v45  ;;  %v1393_v50 = vpop.f32.mrb[35].mxu1  ;;  %v844_v51 = vadd.f32 %v1355_v40, %v2050_v39 }
 0x13b   :  { %v1394_v52 = vadd.f32 %v1393_v50, %v1392_v47  ;;  %v2090_v53 = vadd.f32 %v1391_v46, %v795_v14 }
 0x13c   :  { %v847_v54 = vadd.f32 %v1358_v49, %v2053_v41 }
 0x13d   :  { %v2093_v27 = vadd.f32 %v1394_v52, %v798_v16 }
 0x13e   :  { %v1359_v56 = vpop.f32.mrb[36].mxu0 }
 0x13f   :  { %v1395_v58 = vpop.f32.mrb[36].mxu1  ;;  %v1360_v59 = vpop.f32.mrb[37].mxu0 }
 0x140   :  { %v1361_v61 = vadd.f32 %v1360_v59, %v1359_v56  ;;  %v1396_v63 = vpop.f32.mrb[37].mxu1  ;;  %v1362_v0 = vpop.f32.mrb[38].mxu0 }
 0x141   :  { %v1397_v1 = vadd.f32 %v1396_v63, %v1395_v58  ;;  %v1398_v2 = vpop.f32.mrb[38].mxu1  ;;  %v1363_v3 = vpop.f32.mrb[39].mxu0 }
 0x142   :  { %v1364_v4 = vadd.f32 %v1363_v3, %v1362_v0  ;;  %v1399_v5 = vpop.f32.mrb[39].mxu1  ;;  %v852_v39 = vadd.f32 %v1361_v61, %v2056_v55 }
 0x143   :  { %v1400_v6 = vadd.f32 %v1399_v5, %v1398_v2  ;;  %v2096_v8 = vadd.f32 %v1397_v1, %v803_v33 }
 0x144   :  { %v855_v41 = vadd.f32 %v1364_v4, %v2059_v57  ;;  %v2105_v57 = vld [vmem:[%s2152_s3] ss:$0 sm:$0xff] }
 0x145   :  { %v2099_v10 = vadd.f32 %v1400_v6, %v806_v35 }
 0x146   :  { %v1365_v11 = vpop.f32.mrb[40].mxu0 }
 0x147   :  { %v1414_v12 = vpop.f32.mrb[40].mxu1  ;;  %v1366_v13 = vpop.f32.mrb[41].mxu0 }
 0x148   :  { %v949_v14 = vadd.f32 %v1414_v12, %v852_v39  ;;  %v1367_v15 = vadd.f32 %v1366_v13, %v1365_v11  ;;  %v940_v16 = vpop.f32.mrb[41].mxu1  ;;  %v1368_v17 = vpop.f32.mrb[42].mxu0 }
 0x149   :  { %v941_v18 = vadd.f32 %v940_v16, %v844_v51  ;;  %v1415_v19 = vpop.f32.mrb[42].mxu1  ;;  %v1369_v20 = vpop.f32.mrb[43].mxu0 }
 0x14a   :  { %v952_v21 = vadd.f32 %v1415_v19, %v855_v41  ;;  %v1370_v22 = vadd.f32 %v1369_v20, %v1368_v17  ;;  %v943_v55 = vpop.f32.mrb[43].mxu1  ;;  %v860_v24 = vadd.f32 %v1367_v15, %v2062_v7  ;;  %v1021_v34 = vmul.f32 0.1, %v949_v14 }
 0x14b   :  { %v1019_v26 = vmul.f32 0.1, %v941_v18  ;;  %v944_v28 = vadd.f32 %v943_v55, %v847_v54  ;;  %vm1003_vm1 = vcmp.gt.f32.partialorder %v941_v18, 0.0  ;;  %vm1005_vm3 = vcmp.gt.f32.partialorder %v949_v14, 0.0 }
 0x14c   :  { %v863_v29 = vadd.f32 %v1370_v22, %v2065_v9  ;;  %v1022_v50 = vmul.f32 0.1, %v952_v21  ;;  %v1037_v52 = vsel %vm1005_vm3, %v949_v14, %v1021_v34  ;;  %vm1006_vm4 = vcmp.gt.f32.partialorder %v952_v21, 0.0 }
 0x14d   :  { %v1020_v30 = vmul.f32 0.1, %v944_v28  ;;  %v1035_v31 = vsel %vm1003_vm1, %v941_v18, %v1019_v26  ;;  %vm1004_vm2 = vcmp.gt.f32.partialorder %v944_v28, 0.0  ;;  %v1060_v61 = vmul.f32 %v2105_v57, %v1037_v52 }
 0x14e   :  { %v1371_v32 = vpop.f32.mrb[44].mxu0  ;;  %v1058_v33 = vmul.f32 %v2105_v57, %v1035_v31 }
 0x14f   :  { %v1418_v35 = vpop.f32.mrb[44].mxu1  ;;  %v1372_v36 = vpop.f32.mrb[45].mxu0  ;;  %v1036_v7 = vsel %vm1004_vm2, %v944_v28, %v1020_v30 }
 0x150   :  { %v1373_v37 = vadd.f32 %v1372_v36, %v1371_v32  ;;  %v956_v38 = vpop.f32.mrb[45].mxu1  ;;  %1074 = vxpose.xlu0.b32.start [1/16] %v1058_v33, 128  ;;  %v1374_v40 = vpop.f32.mrb[46].mxu0  ;;  %v1059_v49 = vmul.f32 %v2105_v57, %v1036_v7 }
 0x151   :  { %v957_v43 = vadd.f32 %v956_v38, %v860_v24  ;;  %v1419_v45 = vpop.f32.mrb[46].mxu1  ;;  %v1375_v46 = vpop.f32.mrb[47].mxu0 }
 0x152   :  { %v868_v9 = vadd.f32 %v1373_v37, %v2068_v23  ;;  %v1376_v47 = vadd.f32 %v1375_v46, %v1374_v40  ;;  %v959_v48 = vpop.f32.mrb[47].mxu1  ;;  %v1038_v23 = vsel %vm1006_vm4, %v952_v21, %v1022_v50 }
 0x153   :  { %v960_v51 = vadd.f32 %v959_v48, %v863_v29  ;;  %v1023_v63 = vmul.f32 0.1, %v957_v43  ;;  %vm1007_vm5 = vcmp.gt.f32.partialorder %v957_v43, 0.0  ;;  %v1061_v41 = vmul.f32 %v2105_v57, %v1038_v23 }
 0x154   :  { %v965_v54 = vadd.f32 %v1418_v35, %v868_v9  ;;  %v871_v56 = vadd.f32 %v1376_v47, %v2071_v25  ;;  %1075 = vxpose.xlu0.b32.cont [2/16] %v1059_v49, 128 }
 0x155   :  { %v1024_v12 = vmul.f32 0.1, %v960_v51  ;;  %v1039_v13 = vsel %vm1007_vm5, %v957_v43, %v1023_v63  ;;  %vm1008_vm6 = vcmp.gt.f32.partialorder %v960_v51, 0.0 }
 0x156   :  { %v968_v58 = vadd.f32 %v1419_v45, %v871_v56  ;;  %v1377_v59 = vpop.f32.mrb[48].mxu0  ;;  %v1062_v18 = vmul.f32 %v2105_v57, %v1039_v13  ;;  %v1025_v22 = vmul.f32 0.1, %v965_v54  ;;  %vm1009_vm7 = vcmp.gt.f32.partialorder %v965_v54, 0.0 }
 0x157   :  { %v1378_v0 = vpop.f32.mrb[49].mxu0  ;;  %v1422_v1 = vpop.f32.mrb[48].mxu1  ;;  %v1040_v21 = vsel %vm1008_vm6, %v960_v51, %v1024_v12 }
 0x158   :  { %v1379_v2 = vadd.f32 %v1378_v0, %v1377_v59  ;;  %1076 = vxpose.xlu0.b32.cont [3/16] %v1060_v61, 128  ;;  %v1380_v3 = vpop.f32.mrb[50].mxu0  ;;  %v972_v4 = vpop.f32.mrb[49].mxu1  ;;  %v1063_v34 = vmul.f32 %v2105_v57, %v1040_v21  ;;  %v1026_v36 = vmul.f32 0.1, %v968_v58  ;;  %vm1010_vm8 = vcmp.gt.f32.partialorder %v968_v58, 0.0 }
 0x159   :  { %v1381_v5 = vpop.f32.mrb[51].mxu0  ;;  %v1423_v39 = vpop.f32.mrb[50].mxu1 }
 0x15a   :  { %v1382_v6 = vadd.f32 %v1381_v5, %v1380_v3  ;;  %v876_v25 = vadd.f32 %v1379_v2, %v2074_v42  ;;  %v975_v11 = vpop.f32.mrb[51].mxu1 }
 0x15c   :  { %v973_v14 = vadd.f32 %v972_v4, %v876_v25  ;;  %1077 = vxpose.xlu0.b32.cont [4/16] %v1061_v41, 128  ;;  %v879_v15 = vadd.f32 %v1382_v6, %v2077_v44 }
 0x15e   :  { %v976_v16 = vadd.f32 %v975_v11, %v879_v15  ;;  %v1383_v17 = vpop.f32.mrb[52].mxu0  ;;  %v1027_v40 = vmul.f32 0.1, %v973_v14  ;;  %vm1011_vm9 = vcmp.gt.f32.partialorder %v973_v14, 0.0 }
 0x15f   :  { %v1426_v19 = vpop.f32.mrb[52].mxu1  ;;  %v1384_v20 = vpop.f32.mrb[53].mxu0 }
 0x160   :  { %v997_v42 = vadd.f32 %v1426_v19, %v2096_v8  ;;  %v1385_v55 = vadd.f32 %v1384_v20, %v1383_v17  ;;  %v988_v24 = vpop.f32.mrb[53].mxu1  ;;  %1078 = vxpose.xlu0.b32.cont [5/16] %v1062_v18, 128  ;;  %v1386_v26 = vpop.f32.mrb[54].mxu0  ;;  %v1041_v8 = vsel %vm1009_vm7, %v965_v54, %v1025_v22  ;;  %v1028_v43 = vmul.f32 0.1, %v976_v16 }
 0x161   :  { %v989_v28 = vadd.f32 %v988_v24, %v2090_v53  ;;  %v1427_v29 = vpop.f32.mrb[54].mxu1  ;;  %v1387_v44 = vpop.f32.mrb[55].mxu0  ;;  %v1064_v38 = vmul.f32 %v2105_v57, %v1041_v8  ;;  %v1043_v45 = vsel %vm1011_vm9, %v973_v14, %v1027_v40  ;;  %vm1012_vm10 = vcmp.gt.f32.partialorder %v976_v16, 0.0 }
 0x162   :  { %v884_v30 = vadd.f32 %v1385_v55, %v2080_v60  ;;  %v1000_v31 = vadd.f32 %v1427_v29, %v2099_v10  ;;  %v1388_v32 = vadd.f32 %v1387_v44, %v1386_v26  ;;  %v991_v33 = vpop.f32.mrb[55].mxu1  ;;  %v1042_v60 = vsel %vm1010_vm8, %v968_v58, %v1026_v36 }
 0x163   :  { %v992_v35 = vadd.f32 %v991_v33, %v2093_v27  ;;  %v1065_v10 = vmul.f32 %v2105_v57, %v1042_v60  ;;  %v1066_v27 = vmul.f32 %v2105_v57, %v1043_v45  ;;  %v1044_v46 = vsel %vm1012_vm10, %v976_v16, %v1028_v43 }
 0x164   :  { %v981_v7 = vadd.f32 %v1422_v1, %v884_v30  ;;  %v887_v37 = vadd.f32 %v1388_v32, %v2083_v62  ;;  %1079 = vxpose.xlu0.b32.cont [6/16] %v1063_v34, 128  ;;  %v1067_v62 = vmul.f32 %v2105_v57, %v1044_v46  ;;  %v1031_v50 = vmul.f32 0.1, %v989_v28 }
 0x165   :  { %vm1015_vm13 = vcmp.gt.f32.partialorder %v989_v28, 0.0  ;;  %v1032_v54 = vmul.f32 0.1, %v992_v35  ;;  %vm1016_vm14 = vcmp.gt.f32.partialorder %v992_v35, 0.0  ;;  %v1033_v59 = vmul.f32 0.1, %v997_v42 }
 0x166   :  { %v984_v53 = vadd.f32 %v1423_v39, %v887_v37  ;;  %v1029_v9 = vmul.f32 0.1, %v981_v7  ;;  %vm1013_vm11 = vcmp.gt.f32.partialorder %v981_v7, 0.0  ;;  %v1047_v56 = vsel %vm1015_vm13, %v989_v28, %v1031_v50 }
 0x167   :  { %v1070_v58 = vmul.f32 %v2105_v57, %v1047_v56  ;;  %v1048_v61 = vsel %vm1016_vm14, %v992_v35, %v1032_v54  ;;  %vm1017_vm15 = vcmp.gt.f32.partialorder %v997_v42, 0.0  ;;  %v1034_v0 = vmul.f32 0.1, %v1000_v31 }
 0x168   :  { %1080 = vxpose.xlu0.b32.cont [7/16] %v1064_v38, 128  ;;  %v1045_v47 = vsel %vm1013_vm11, %v981_v7, %v1029_v9  ;;  %v1030_v48 = vmul.f32 0.1, %v984_v53  ;;  %vm1014_vm12 = vcmp.gt.f32.partialorder %v984_v53, 0.0  ;;  %v1071_v63 = vmul.f32 %v2105_v57, %v1048_v61 }
 0x169   :  { %v1068_v49 = vmul.f32 %v2105_v57, %v1045_v47  ;;  %v1049_v1 = vsel %vm1017_vm15, %v997_v42, %v1033_v59  ;;  %vm1018_vm0 = vcmp.gt.f32.partialorder %v1000_v31, 0.0 }
 0x16a   :  { %v1046_v51 = vsel %vm1014_vm12, %v984_v53, %v1030_v48  ;;  %v1072_v23 = vmul.f32 %v2105_v57, %v1049_v1  ;;  %v1050_v2 = vsel %vm1018_vm0, %v1000_v31, %v1034_v0  ;;  %v1128_v53 = vstv %s2153_s4 }
 0x16b   :  { %v1069_v52 = vmul.f32 %v2105_v57, %v1046_v51  ;;  %v1073_v3 = vmul.f32 %v2105_v57, %v1050_v2 }
 0x16c   :  { %1081 = vxpose.xlu0.b32.cont [8/16] %v1065_v10, 128 }
 0x170   :  { %1082 = vxpose.xlu0.b32.cont [9/16] %v1066_v27, 128 }
 0x174   :  { %1083 = vxpose.xlu0.b32.cont [10/16] %v1067_v62, 128 }
 0x178   :  { %1084 = vxpose.xlu0.b32.cont [11/16] %v1068_v49, 128 }
 0x17c   :  { %1085 = vxpose.xlu0.b32.cont [12/16] %v1069_v52, 128 }
 0x180   :  { %1086 = vxpose.xlu0.b32.cont [13/16] %v1070_v58, 128 }
 0x184   :  { %1087 = vxpose.xlu0.b32.cont [14/16] %v1071_v63, 128 }
 0x188   :  { %1088 = vxpose.xlu0.b32.cont [15/16] %v1072_v23, 128 }
 0x18c   :  { %1089 = vxpose.xlu0.b32.end [16/16] %v1073_v3, 128 }
 0x1d0   :  { %v1090_v4 = vpop.trf.xlu0 }
 0x1d4   :  { %v1091_v5 = vpop.trf.xlu0 }
 0x1d5   :  { %v1106_v14 = vadd.f32 %v1091_v5, %v1090_v4 }
 0x1d8   :  { %v1092_v39 = vpop.trf.xlu0 }
 0x1d9   :  { %v1107_v15 = vadd.f32 %v1106_v14, %v1092_v39 }
 0x1dc   :  { %v1093_v6 = vpop.trf.xlu0 }
 0x1dd   :  { %v1108_v17 = vadd.f32 %v1107_v15, %v1093_v6 }
 0x1e0   :  { %v1094_v25 = vpop.trf.xlu0 }
 0x1e1   :  { %v1109_v18 = vadd.f32 %v1108_v17, %v1094_v25 }
 0x1e4   :  { %v1095_v41 = vpop.trf.xlu0 }
 0x1e5   :  { %v1110_v20 = vadd.f32 %v1109_v18, %v1095_v41 }
 0x1e8   :  { %v1096_v11 = vpop.trf.xlu0 }
 0x1e9   :  { %v1111_v21 = vadd.f32 %v1110_v20, %v1096_v11 }
 0x1ec   :  { %v1097_v12 = vpop.trf.xlu0 }
 0x1ed   :  { %v1112_v57 = vadd.f32 %v1111_v21, %v1097_v12 }
 0x1f0   :  { %v1098_v13 = vpop.trf.xlu0 }
 0x1f1   :  { %v1113_v42 = vadd.f32 %v1112_v57, %v1098_v13 }
 0x1f4   :  { %v1099_v16 = vpop.trf.xlu0 }
 0x1f5   :  { %v1114_v24 = vadd.f32 %v1113_v42, %v1099_v16 }
 0x1f8   :  { %v1100_v19 = vpop.trf.xlu0 }
 0x1f9   :  { %v1115_v26 = vadd.f32 %v1114_v24, %v1100_v19 }
 0x1fc   :  { %v1101_v22 = vpop.trf.xlu0 }
 0x1fd   :  { %v1116_v29 = vadd.f32 %v1115_v26, %v1101_v22 }
 0x200   :  { %v1102_v55 = vpop.trf.xlu0 }
 0x201   :  { %v1117_v44 = vadd.f32 %v1116_v29, %v1102_v55 }
 0x204   :  { %v1103_v28 = vpop.trf.xlu0 }
 0x205   :  { %v1118_v31 = vadd.f32 %v1117_v44, %v1103_v28 }
 0x208   :  { %v1104_v30 = vpop.trf.xlu0 }
 0x209   :  { %v1119_v32 = vadd.f32 %v1118_v31, %v1104_v30 }
 0x20c   :  { %v1105_v33 = vpop.trf.xlu0 }
 0x20d   :  { %v1120_v34 = vadd.f32 %v1119_v32, %v1105_v33 }
 0x20f   :  { %v1121_v35 = vrot.slane %v1120_v34, 4 }
 0x211   :  { %v1122_v8 = vadd.f32 %v1121_v35, %v1120_v34 }
 0x213   :  { %v1123_v36 = vrot.slane %v1122_v8, 2 }
 0x215   :  { %v1124_v7 = vadd.f32 %v1123_v36, %v1122_v8 }
 0x217   :  { %v1125_v37 = vrot.slane %v1124_v7, 1 }
 0x219   :  { %v1126_v38 = vadd.f32 %v1125_v37, %v1124_v7 }
 0x21b   :  { %v1129_v40 = vadd.f32 %v1128_v53, %v1126_v38 }
 0x21d   :  { %v1130_v60 = vsub.f32 0.0, %v1129_v40 }
 0x21f   :  { %v1131_v10 = vmul.f32 1.442695, %v1130_v60 }
 0x221   :  { %1494 = vpow2.f32 %v1131_v10 }
 0x22b   :  { %v1495_v43 = vpop.eup %1494 }
 0x22c   :  { %v1133_v45 = vadd.f32 1.0, %v1495_v43 }
 0x22e   :  { %1496 = vrcp.f32 %v1133_v45 }
 0x238   :  { %v1497_v27 = vpop.eup %1496 }
 0x239   :  { %1135 = vst [vmem:[#allocation3] sm:$0x1] %v1497_v27 }
 0x23a   :  { %1509 = shalt.err (!%p1506_p4)
}
 0x23b   :  { %s1510_s18 = scalar_lea.hbm %s2154_s5, 16 }
 0x23c   :  { %p1511_p5 = scmp.ne.s32.totalorder %s2154_s5, %s1510_s18  ;;  %p1514_p6 = scmp.lt.u32.totalorder %s1510_s18, %s2154_s5 }
 0x23e   :  { %p1516_p7 = pnand %p1514_p6, %p1511_p5 }
 0x240   :  { %1519 = shalt.err (!%p1516_p7)
}
 0x241   :  { %1145 = dma.vmem_to_hbm [thread:$0]  %s1143_s14, 16, %s2154_s5, [#allocation4]  }
 0x242   :  { %1520 = dma.done.wait [#allocation4], 16  }
 0x243   :  { %1521 = vsyncadd [#allocation4], 4294967280 }
 0x244   :  { %1149 = vsyncpa [#allocation4], 1 }

</bundles_post_ra>
